<compile_context>
chip_gen: v6e
topology: v6e:2x2x1
jax: 0.10.0
libtpu: 0.0.40
codegen_flags: <defaults>
</compile_context>

<pallas_src>
import functools

import jax
import jax.numpy as jnp
from jax.experimental import pallas as pl
from jax.experimental.pallas import tpu as pltpu


def _qkv_proj_kernel(x_ref, w_ref, b_ref, q_ref, k_ref, v_ref, *, compute_dtype):
    # x tile: (tm, D).  Cast to the MXU input dtype in-kernel (VPU filler).
    x = x_ref[...].astype(compute_dtype)
    # w tile: (3, D, tn) fused weight slab; b tile: (3, 1, tn) f32 bias.
    for p, o_ref in enumerate((q_ref, k_ref, v_ref)):
        acc = jnp.dot(x, w_ref[p], preferred_element_type=jnp.float32)
        o_ref[...] = (acc + b_ref[p]).astype(o_ref.dtype)


def _pick_tile(total, preferred):
    """Largest candidate (in preference order) that divides `total`, else the
    full axis (a block equal to the full array dim is always legal)."""
    for t in preferred:
        if t is not None and t <= total and total % t == 0:
            return t
    return total


def _chip_defaults():
    """(preferred tile_m, VMEM cap in bytes) per TPU generation."""
    try:
        kind = jax.devices()[0].device_kind.lower()
    except Exception:  # pragma: no cover
        kind = ""
    if "v6" in kind:          # v6e: 128 MiB VMEM, roofline knee ~680 FLOP/B
        return 1024, 96 << 20
    if "v5" in kind:          # v5e: 128 MiB VMEM, knee ~240 FLOP/B
        return 512, 96 << 20
    # v7x (64 MiB per TC, knee ~310 FLOP/B per TC) and unknown chips.
    return 512, 48 << 20


def _vmem_estimate(tm, tn, d, x_bytes, c_bytes, o_bytes):
    return (2 * tm * d * x_bytes          # activation tile (double-buffered)
            + 2 * 3 * d * tn * c_bytes    # fused weight slab
            + 2 * 3 * tn * 4              # bias
            + 2 * 3 * tm * tn * o_bytes   # q/k/v output tiles
            + (4 << 20))                  # margin for Mosaic internal scratch


def fuse_qkv_params(wq, bq, wk, bk, wv, bv, *, compute_dtype=jnp.bfloat16):
    """Build the fused, pre-transposed weight ONCE (outside the hot path).

    wq/wk/wv: (D, D) PyTorch nn.Linear layout (out, in).  b*: (D,).
    Returns w_cat: (3, D, D) in `compute_dtype` with (in, out) layout per slab,
    b_cat: (3, 1, D) in float32.
    """
    w_cat = jnp.stack([wq.T, wk.T, wv.T], axis=0).astype(compute_dtype)
    b_cat = jnp.stack([bq, bk, bv], axis=0).reshape(3, 1, -1).astype(jnp.float32)
    return w_cat, b_cat


def multi_projection(x, w_cat, b_cat, *, tile_m=None, tile_n=None,
                     out_dtype=None, compute_dtype=jnp.bfloat16):
    """x: (B, S, D); w_cat: (3, D, D); b_cat: (3, 1, D).

    Returns (q, k, v), each (B, S, D), matching torch nn.Linear
    proj_q/proj_k/proj_v(x) (bf16-input MXU matmul, f32 accumulation).
    """
    B, S, D = x.shape
    M = B * S
    assert w_cat.shape == (3, D, D), "w_cat must be the fused (3, D, D) weight"
    assert b_cat.shape == (3, 1, D)
    if out_dtype is None:
        out_dtype = x.dtype   # set to jnp.bfloat16 to halve output HBM traffic

    tm_pref, vmem_cap = _chip_defaults()
    if tile_m is None:
        tile_m = tm_pref
    if tile_n is None:
        tile_n = 512

    # Tile sizes: biggest preferred size that divides the axis.  Small demo
    # shapes fall back to full-axis blocks (always legal); real shapes
    # (D multiple of 128, large M) get 512/1024-row x 512-lane MXU slabs.
    tm = _pick_tile(M, (tile_m, 1024, 768, 512, 384, 256, 128, 64, 32, 16, 8))
    tn = _pick_tile(D, (tile_n, 512, 384, 256, 128))

    x_bytes = jnp.dtype(x.dtype).itemsize
    c_bytes = jnp.dtype(compute_dtype).itemsize
    o_bytes = jnp.dtype(out_dtype).itemsize

    # Shrink tiles until the footprint fits the per-chip VMEM cap; raise
    # (rather than silently clamping) if even the smallest tiles don't fit.
    while _vmem_estimate(tm, tn, D, x_bytes, c_bytes, o_bytes) > vmem_cap:
        if tm >= 256 and tm % 2 == 0 and M % (tm // 2) == 0:
            tm //= 2
        elif tn >= 256 and tn % 2 == 0 and D % (tn // 2) == 0:
            tn //= 2
        else:
            raise ValueError(
                f"multi_projection tiles (tm={tm}, tn={tn}, D={D}) exceed the "
                f"VMEM budget ({vmem_cap >> 20} MiB); a K-tiled accumulator "
                f"path is required for this configuration.")
    est = _vmem_estimate(tm, tn, D, x_bytes, c_bytes, o_bytes)
    vmem_limit = int(min(max(est, 16 << 20), vmem_cap))

    x2 = x.reshape(M, D)   # free reshape; cast to bf16 happens in-kernel
    w_cat = w_cat.astype(compute_dtype)
    b_cat = b_cat.astype(jnp.float32)

    out_sds = jax.ShapeDtypeStruct((M, D), out_dtype)
    kernel = functools.partial(_qkv_proj_kernel, compute_dtype=compute_dtype)

    q2, k2, v2 = pl.pallas_call(
        kernel,
        out_shape=(out_sds, out_sds, out_sds),
        grid_spec=pltpu.PrefetchScalarGridSpec(
            num_scalar_prefetch=0,
            # M outer, N inner: the x block index is constant across the inner
            # sweep (stays resident in VMEM); the (3, D, tn) weight slab streams.
            grid=(M // tm, D // tn),
            in_specs=[
                pl.BlockSpec((tm, D), lambda i, j: (i, 0)),        # activations
                pl.BlockSpec((3, D, tn), lambda i, j: (0, 0, j)),  # fused weight
                pl.BlockSpec((3, 1, tn), lambda i, j: (0, 0, j)),  # bias (f32)
            ],
            out_specs=[
                pl.BlockSpec((tm, tn), lambda i, j: (i, j)),       # q
                pl.BlockSpec((tm, tn), lambda i, j: (i, j)),       # k
                pl.BlockSpec((tm, tn), lambda i, j: (i, j)),       # v
            ],
        ),
        compiler_params=pltpu.CompilerParams(
            # Outer (M) axis is the one the runtime may shard across
            # TensorCores on v7x; inner weight-stream axis stays sequential.
            dimension_semantics=("parallel", "arbitrary"),
            vmem_limit_bytes=vmem_limit,
        ),
    )(x2, w_cat, b_cat)

    return (q2.reshape(B, S, D), k2.reshape(B, S, D), v2.reshape(B, S, D))


def _init_linear_params(key, d):
    """Deterministic nn.Linear-style init: U(-1/sqrt(d), 1/sqrt(d))."""
    kw, kb = jax.random.split(key)
    bound = 1.0 / (d ** 0.5)
    w = jax.random.uniform(kw, (d, d), jnp.float32, -bound, bound)  # (out, in)
    b = jax.random.uniform(kb, (d,), jnp.float32, -bound, bound)
    return w, b


if __name__ == "__main__":
    B, S, D = 2, 8, 32  # (batch, seq, hidden) -- small demo shapes
    key = jax.random.PRNGKey(0)
    kx, kq, kk, kv = jax.random.split(key, 4)

    x = jax.random.normal(kx, (B, S, D), jnp.float32)
    wq, bq = _init_linear_params(kq, D)
    wk, bk = _init_linear_params(kk, D)
    wv, bv = _init_linear_params(kv, D)

    # Fused/pre-transposed params built once, outside the per-call path.
    w_cat, b_cat = fuse_qkv_params(wq, bq, wk, bk, wv, bv)

    q, k, v = multi_projection(x, w_cat, b_cat)
    jax.block_until_ready((q, k, v))

    # Reference 1 (tight): same bf16-cast inputs, f32 math -> isolates kernel
    # plumbing from the intentional bf16 quantization of MXU inputs.
    xb2 = x.astype(jnp.bfloat16).astype(jnp.float32).reshape(-1, D)
    wc_f32 = w_cat.astype(jnp.float32)
    q_t = (xb2 @ wc_f32[0] + b_cat[0]).reshape(B, S, D)
    k_t = (xb2 @ wc_f32[1] + b_cat[1]).reshape(B, S, D)
    v_t = (xb2 @ wc_f32[2] + b_cat[2]).reshape(B, S, D)

    # Reference 2 (loose): exact nn.Linear semantics in full f32.
    q_f = x @ wq.T + bq
    k_f = x @ wk.T + bk
    v_f = x @ wv.T + bv

    for got, tight, loose in ((q, q_t, q_f), (k, k_t, k_f), (v, v_t, v_f)):
        assert jnp.allclose(got.astype(jnp.float32), tight, atol=2e-3, rtol=2e-3), \
            "tight check failed"
        assert jnp.allclose(got.astype(jnp.float32), loose, atol=1e-1, rtol=1e-1), \
            "loose check failed"

    print("KERNEL_OK")
</pallas_src>

<mosaic_0001>
module attributes {stable_mosaic.version = 11 : i64} {
  func.func @_qkv_proj_kernel(%arg0: i32, %arg1: i32, %arg2: memref<16x32xf32, #tpu.memory_space<vmem>>, %arg3: memref<3x32x32xbf16, #tpu.memory_space<vmem>>, %arg4: memref<3x1x32xf32, #tpu.memory_space<vmem>>, %arg5: memref<16x32xf32, #tpu.memory_space<vmem>>, %arg6: memref<16x32xf32, #tpu.memory_space<vmem>>, %arg7: memref<16x32xf32, #tpu.memory_space<vmem>>) attributes {dimension_semantics = [#tpu.dimension_semantics<parallel>, #tpu.dimension_semantics<arbitrary>], iteration_bounds = array<i64: 1, 1>, scalar_prefetch = 0 : i64, scratch_operands = 0 : i64, tpu.core_type = #tpu.core_type<tc>, window_params = [{transform_indices = @transform_0, window_bounds = array<i64: 16, 32>}, {transform_indices = @transform_1, window_bounds = array<i64: 3, 32, 32>}, {transform_indices = @transform_2, window_bounds = array<i64: 3, 1, 32>}, {transform_indices = @transform_3, window_bounds = array<i64: 16, 32>}, {transform_indices = @transform_4, window_bounds = array<i64: 16, 32>}, {transform_indices = @transform_5, window_bounds = array<i64: 16, 32>}]} {
    %c0 = arith.constant 0 : index
    %c0_0 = arith.constant 0 : index
    %0 = vector.load %arg2[%c0, %c0_0] : memref<16x32xf32, #tpu.memory_space<vmem>>, vector<16x32xf32>
    %1 = arith.truncf %0 : vector<16x32xf32> to vector<16x32xbf16>
    %c0_1 = arith.constant 0 : index
    %c0_2 = arith.constant 0 : index
    %c0_3 = arith.constant 0 : index
    %2 = vector.load %arg3[%c0_1, %c0_2, %c0_3] : memref<3x32x32xbf16, #tpu.memory_space<vmem>>, vector<1x32x32xbf16>
    %3 = vector.shape_cast %2 : vector<1x32x32xbf16> to vector<32x32xbf16>
    %cst = arith.constant dense<0.000000e+00> : vector<16x32xf32>
    %4 = tpu.matmul %1, %3, %cst {dimension_numbers = #tpu.dot_dimension_numbers<[1], [0], [0], [1], [0, 0, 1, 1], [], []>} : vector<16x32xbf16>, vector<32x32xbf16>, vector<16x32xf32> -> vector<16x32xf32>
    %c0_4 = arith.constant 0 : index
    %c0_5 = arith.constant 0 : index
    %c0_6 = arith.constant 0 : index
    %5 = vector.load %arg4[%c0_4, %c0_5, %c0_6] : memref<3x1x32xf32, #tpu.memory_space<vmem>>, vector<1x1x32xf32>
    %6 = vector.shape_cast %5 : vector<1x1x32xf32> to vector<1x32xf32>
    %7 = vector.broadcast %6 : vector<1x32xf32> to vector<16x32xf32>
    %8 = arith.addf %4, %7 : vector<16x32xf32>
    %c0_7 = arith.constant 0 : index
    %c0_8 = arith.constant 0 : index
    %9 = vector.load %arg5[%c0_7, %c0_8] : memref<16x32xf32, #tpu.memory_space<vmem>>, vector<16x32xf32>
    tpu.vector_store %arg5[%c0_7, %c0_8], %8 {strides = array<i32>} : memref<16x32xf32, #tpu.memory_space<vmem>>, vector<16x32xf32>,
    %c1 = arith.constant 1 : index
    %c0_9 = arith.constant 0 : index
    %c0_10 = arith.constant 0 : index
    %10 = vector.load %arg3[%c1, %c0_9, %c0_10] : memref<3x32x32xbf16, #tpu.memory_space<vmem>>, vector<1x32x32xbf16>
    %11 = vector.shape_cast %10 : vector<1x32x32xbf16> to vector<32x32xbf16>
    %cst_11 = arith.constant dense<0.000000e+00> : vector<16x32xf32>
    %12 = tpu.matmul %1, %11, %cst_11 {dimension_numbers = #tpu.dot_dimension_numbers<[1], [0], [0], [1], [0, 0, 1, 1], [], []>} : vector<16x32xbf16>, vector<32x32xbf16>, vector<16x32xf32> -> vector<16x32xf32>
    %c1_12 = arith.constant 1 : index
    %c0_13 = arith.constant 0 : index
    %c0_14 = arith.constant 0 : index
    %13 = vector.load %arg4[%c1_12, %c0_13, %c0_14] : memref<3x1x32xf32, #tpu.memory_space<vmem>>, vector<1x1x32xf32>
    %14 = vector.shape_cast %13 : vector<1x1x32xf32> to vector<1x32xf32>
    %15 = vector.broadcast %14 : vector<1x32xf32> to vector<16x32xf32>
    %16 = arith.addf %12, %15 : vector<16x32xf32>
    %c0_15 = arith.constant 0 : index
    %c0_16 = arith.constant 0 : index
    %17 = vector.load %arg6[%c0_15, %c0_16] : memref<16x32xf32, #tpu.memory_space<vmem>>, vector<16x32xf32>
    tpu.vector_store %arg6[%c0_15, %c0_16], %16 {strides = array<i32>} : memref<16x32xf32, #tpu.memory_space<vmem>>, vector<16x32xf32>,
    %c2 = arith.constant 2 : index
    %c0_17 = arith.constant 0 : index
    %c0_18 = arith.constant 0 : index
    %18 = vector.load %arg3[%c2, %c0_17, %c0_18] : memref<3x32x32xbf16, #tpu.memory_space<vmem>>, vector<1x32x32xbf16>
    %19 = vector.shape_cast %18 : vector<1x32x32xbf16> to vector<32x32xbf16>
    %cst_19 = arith.constant dense<0.000000e+00> : vector<16x32xf32>
    %20 = tpu.matmul %1, %19, %cst_19 {dimension_numbers = #tpu.dot_dimension_numbers<[1], [0], [0], [1], [0, 0, 1, 1], [], []>} : vector<16x32xbf16>, vector<32x32xbf16>, vector<16x32xf32> -> vector<16x32xf32>
    %c2_20 = arith.constant 2 : index
    %c0_21 = arith.constant 0 : index
    %c0_22 = arith.constant 0 : index
    %21 = vector.load %arg4[%c2_20, %c0_21, %c0_22] : memref<3x1x32xf32, #tpu.memory_space<vmem>>, vector<1x1x32xf32>
    %22 = vector.shape_cast %21 : vector<1x1x32xf32> to vector<1x32xf32>
    %23 = vector.broadcast %22 : vector<1x32xf32> to vector<16x32xf32>
    %24 = arith.addf %20, %23 : vector<16x32xf32>
    %c0_23 = arith.constant 0 : index
    %c0_24 = arith.constant 0 : index
    %25 = vector.load %arg7[%c0_23, %c0_24] : memref<16x32xf32, #tpu.memory_space<vmem>>, vector<16x32xf32>
    tpu.vector_store %arg7[%c0_23, %c0_24], %24 {strides = array<i32>} : memref<16x32xf32, #tpu.memory_space<vmem>>, vector<16x32xf32>,
    return
  }
  func.func @transform_0(%arg0: i32, %arg1: i32) -> (i32, i32) {
    %c0_i32 = arith.constant 0 : i32
    %c0_i32_0 = arith.constant 0 : i32
    return %arg0, %c0_i32 : i32, i32
  }
  func.func @transform_1(%arg0: i32, %arg1: i32) -> (i32, i32, i32) {
    %c0_i32 = arith.constant 0 : i32
    %c0_i32_0 = arith.constant 0 : i32
    %c0_i32_1 = arith.constant 0 : i32
    return %c0_i32, %c0_i32_0, %arg1 : i32, i32, i32
  }
  func.func @transform_2(%arg0: i32, %arg1: i32) -> (i32, i32, i32) {
    %c0_i32 = arith.constant 0 : i32
    %c0_i32_0 = arith.constant 0 : i32
    %c0_i32_1 = arith.constant 0 : i32
    return %c0_i32, %c0_i32_0, %arg1 : i32, i32, i32
  }
  func.func @transform_3(%arg0: i32, %arg1: i32) -> (i32, i32) {
    %c0_i32 = arith.constant 0 : i32
    return %arg0, %arg1 : i32, i32
  }
  func.func @transform_4(%arg0: i32, %arg1: i32) -> (i32, i32) {
    %c0_i32 = arith.constant 0 : i32
    return %arg0, %arg1 : i32, i32
  }
  func.func @transform_5(%arg0: i32, %arg1: i32) -> (i32, i32) {
    %c0_i32 = arith.constant 0 : i32
    return %arg0, %arg1 : i32, i32
  }
}

</mosaic_0001>

<bundles_post_ra>
// kernel: tpu_custom_call.1
= control target key start
LH: loop header
LB: loop body
LE: loop exit
PB: predicated region body
PF: predicated region fallthrough
CT: control target
= control target key end

     0   :  { %11 = vsyncpa [#allocation3], 0  ;;  %s567_s0 = inlined_call_operand.hbm [shape: f32[16,32], index: 0, kind: input, shape index: {}]   ;;  %s568_s1 = inlined_call_operand.hbm [shape: bf16[3,32,32], index: 1, kind: input, shape index: {}]   ;;  %s569_s2 = inlined_call_operand.vmem [shape: f32[3,1,32], index: 2, kind: input, shape index: {}]   ;;  %s570_s3 = inlined_call_operand.hbm [shape: f32[16,32], index: 3, kind: output, shape index: {0}]   ;;  %s571_s4 = inlined_call_operand.hbm [shape: f32[16,32], index: 4, kind: output, shape index: {1}]   ;;  %s572_s5 = inlined_call_operand.hbm [shape: f32[16,32], index: 5, kind: output, shape index: {2}]  }
   0x1   :  { %12 = vsyncpa [#allocation6], 0 }
   0x2   :  { %13 = vsyncpa [#allocation4], 0 }
   0x3   :  { %14 = vsyncpa [#allocation9], 0  ;;  %s478_s18 = smov [#allocation2]  }
   0x4   :  { %s20_s19 = sshll.u32 %s478_s18, 4  ;;  %s21_s19 = int_to_ptr.vmem [resolvable:$true] %s20_s19 }
   0x5   :  { %s378_s20 = scalar_lea.vmem %s21_s19, 256  ;;  %p383_p1 = scmp.lt.s32.totalorder %s21_s19, %s21_s19 }
   0x6   :  { %p379_p0 = scmp.ne.s32.totalorder %s21_s19, %s378_s20  ;;  %p384_p2 = scmp.lt.s32.totalorder %s378_s20, %s378_s20 }
   0x8   :  { %p385_p3 = por %p384_p2, %p383_p1 }
   0xa   :  { %p386_p4 = pnand %p385_p3, %p379_p0 }
   0xc   :  { %389 = shalt.err (!%p386_p4)
}
   0xd   :  { %s479_s21 = smov 128   ;;  %s480_s22 = smov 8  }
   0xe   :  { %26 = dma.hbm_to_vmem [thread:$0]  %s567_s0, 256, %s21_s19, [#allocation3], %s479_s21, %s479_s21, %s480_s22  }
   0xf   :  { %s481_s25 = smov [#allocation5]  }
  0x10   :  { %s32_s26 = sshll.u32 %s481_s25, 4  ;;  %s33_s26 = int_to_ptr.vmem [resolvable:$true] %s32_s26 }
  0x11   :  { %s398_s27 = scalar_lea.vmem %s33_s26, 768  ;;  %p403_p6 = scmp.lt.s32.totalorder %s33_s26, %s33_s26 }
  0x12   :  { %p399_p5 = scmp.ne.s32.totalorder %s33_s26, %s398_s27  ;;  %p404_p7 = scmp.lt.s32.totalorder %s398_s27, %s398_s27 }
  0x14   :  { %p405_p8 = por %p404_p7, %p403_p6 }
  0x16   :  { %p406_p9 = pnand %p405_p8, %p399_p5 }
  0x18   :  { %409 = shalt.err (!%p406_p9)
}
  0x19   :  { %s482_s28 = smov 64   ;;  %s483_s29 = smov 4  }
  0x1a   :  { %38 = dma.hbm_to_vmem [thread:$0]  %s568_s1, 768, %s33_s26, [#allocation6], %s482_s28, %s482_s28, %s483_s29  }
  0x1b   :  { %470 = dma.done.wait [#allocation3], 256  }
  0x1c   :  { %471 = vsyncadd [#allocation3], 4294967040 }
  0x1d   :  { %472 = dma.done.wait [#allocation6], 768  }
  0x1e   :  { %473 = vsyncadd [#allocation6], 4294966528  ;;  %v484_v0 = vmov 0.0   ;;  %vm485_vm0 = vmmov 0   ;;  %v364_v1 = vld [vmem:[#allocation5 + $0x8] sm:$0xff]   ;;  %v365_v2 = vld [vmem:[#allocation5 + $0x18] sm:$0xff]  }
  0x1f   :  { %329 = vmatprep.subr.bf16.mxu0 %v484_v0  ;;  %337 = vmatprep.subr.bf16.mxu1 %v484_v0  ;;  %v366_v3 = vld [vmem:[#allocation5] sm:$0xff]   ;;  %v367_v4 = vld [vmem:[#allocation5 + $0x10] sm:$0xff]   ;;  %v49_v6 = vld [vmem:[#allocation2 + $0x8] sm:$0xff]  ;;  %vm74_vm1 = vcmask 261120   ;;  %s486_s9 = smov [#allocation7]   ;;  %s487_s11 = smov [#allocation8]  }
  0x20   :  { %333 = vmatprep.mubr.msk.bf16.mxu0 %vm485_vm0, %v484_v0  ;;  %341 = vmatprep.mubr.msk.bf16.mxu1 %vm485_vm0, %v484_v0  ;;  %v48_v5 = vld [vmem:[#allocation2] sm:$0xff]  ;;  %v368_v8 = vld [vmem:[#allocation5 + $0x28] sm:$0xff]   ;;  %v369_v9 = vld [vmem:[#allocation5 + $0x20] sm:$0xff]   ;;  %s262_s10 = sshll.u32 %s486_s9, 4  ;;  %s274_s12 = sshll.u32 %s487_s11, 4  ;;  %s263_s10 = int_to_ptr.vmem [resolvable:$true] %s262_s10  ;;  %s275_s12 = int_to_ptr.vmem [resolvable:$true] %s274_s12 }
  0x21   :  { %330 = vmatpush3.bf16.msra.mxu0 %v364_v1  ;;  %338 = vmatpush3.bf16.msra.mxu1 %v365_v2  ;;  %v50_v7 = vpack.c.bf16 %v49_v6, %v48_v5  ;;  %v306_v10 = vld [vmem:[%s569_s2] ss:$0 sm:$0xff]  ;;  %v311_v11 = vld [vmem:[%s569_s2 + $0x1] ss:$0 sm:$0xff]  ;;  %v316_v23 = vld [vmem:[%s569_s2 + $0x2] ss:$0 sm:$0xff]  ;;  %p415_p11 = scmp.lt.s32.totalorder %s263_s10, %s263_s10 }
  0x22   :  { %331 = vmatprep.subr.bf16.mxu0 %v484_v0  ;;  %339 = vmatprep.subr.bf16.mxu1 %v484_v0  ;;  %s410_s15 = scalar_lea.vmem %s263_s10, 256 }
  0x23   :  { %p411_p10 = scmp.ne.s32.totalorder %s263_s10, %s410_s15  ;;  %p416_p12 = scmp.lt.s32.totalorder %s410_s15, %s410_s15 }
  0x25   :  { %332 = vmatpush3.bf16.msra.mxu0 %v366_v3  ;;  %340 = vmatpush3.bf16.msra.mxu1 %v367_v4  ;;  %p417_p13 = por %p416_p12, %p415_p11 }
  0x26   :  { %345 = vmatprep.subr.bf16.mxu0 %v484_v0 }
  0x27   :  { %p418_p0 = pnand %p417_p13, %p411_p10 }
  0x28   :  { %334 = vmatmul.mubr.msk.bf16.vlgmr.msra.gmra.mxu0 %vm74_vm1, %v50_v7  ;;  %342 = vmatmul.mubr.msk.bf16.vlgmr.msra.gmra.mxu1 %vm74_vm1, %v50_v7 }
  0x29   :  { %346 = vmatpush3.bf16.msra.mxu0 %v368_v8  ;;  %349 = vmatprep.mubr.msk.bf16.mxu0 %vm485_vm0, %v484_v0 }
  0x2a   :  { %347 = vmatprep.subr.bf16.mxu0 %v484_v0 }
  0x2d   :  { %348 = vmatpush3.bf16.msra.mxu0 %v369_v9 }
  0x30   :  { %350 = vmatmul.mubr.msk.bf16.vlgmr.msra.gmra.mxu0 %vm74_vm1, %v50_v7 }
  0xe8   :  { %v112_v12 = vpop.f32.mrf.mxu0  ;;  %v180_v14 = vpop.f32.mrf.mxu1 }
  0xe9   :  { %v113_v13 = vadd.f32 %v306_v10, %v112_v12  ;;  %v181_v16 = vadd.f32 %v311_v11, %v180_v14 }
  0xea   :  { %v335_v15 = vpop.f32.mrf.mxu0  ;;  %v343_v17 = vpop.f32.mrf.mxu1 }
  0xeb   :  { %119 = vst.msk [vmem:[#allocation7] sm:$0xff] %vm74_vm1, %v113_v13  ;;  %187 = vst.msk [vmem:[#allocation8] sm:$0xff] %vm74_vm1, %v181_v16 }
  0xec   :  { %v115_v18 = vpop.f32.mrf.mxu0  ;;  %v183_v20 = vpop.f32.mrf.mxu1 }
  0xed   :  { %v116_v19 = vadd.f32 %v306_v10, %v115_v18  ;;  %v184_v22 = vadd.f32 %v311_v11, %v183_v20 }
  0xee   :  { %v336_v21 = vpop.f32.mrf.mxu0  ;;  %v344_v24 = vpop.f32.mrf.mxu1 }
  0xef   :  { %120 = vst.msk [vmem:[#allocation7 + $0x8] sm:$0xff] %vm74_vm1, %v116_v19  ;;  %188 = vst.msk [vmem:[#allocation8 + $0x8] sm:$0xff] %vm74_vm1, %v184_v22 }
  0xf0   :  { %v248_v25 = vpop.f32.mrf.mxu0 }
  0xf1   :  { %421 = shalt.err (!%p418_p0)
}
  0xf2   :  { %268 = dma.vmem_to_hbm [thread:$0]  %s263_s10, 256, %s570_s3, [#allocation4], %s479_s21, %s479_s21, %s480_s22   ;;  %v249_v26 = vadd.f32 %v316_v23, %v248_v25 }
  0xf3   :  { %s430_s2 = scalar_lea.vmem %s275_s12, 256  ;;  %p435_p2 = scmp.lt.s32.totalorder %s275_s12, %s275_s12 }
  0xf4   :  { %p431_p1 = scmp.ne.s32.totalorder %s275_s12, %s430_s2  ;;  %p436_p3 = scmp.lt.s32.totalorder %s430_s2, %s430_s2 }
  0xf6   :  { %p437_p4 = por %p436_p3, %p435_p2 }
  0xf8   :  { %p438_p5 = pnand %p437_p4, %p431_p1 }
  0xfa   :  { %441 = shalt.err (!%p438_p5)
}
  0xfb   :  { %280 = dma.vmem_to_hbm [thread:$0]  %s275_s12, 256, %s571_s4, [#allocation9], %s479_s21, %s479_s21, %s480_s22   ;;  %v351_v27 = vpop.f32.mrf.mxu0  ;;  %255 = vst.msk [vmem:[#allocation10] sm:$0xff] %vm74_vm1, %v249_v26 }
  0xfc   :  { %s488_s20 = smov [#allocation10]  }
  0xfd   :  { %s286_s23 = sshll.u32 %s488_s20, 4  ;;  %v251_v28 = vpop.f32.mrf.mxu0  ;;  %s287_s23 = int_to_ptr.vmem [resolvable:$true] %s286_s23 }
  0xfe   :  { %v252_v29 = vadd.f32 %v316_v23, %v251_v28  ;;  %s450_s3 = scalar_lea.vmem %s287_s23, 256  ;;  %p455_p7 = scmp.lt.s32.totalorder %s287_s23, %s287_s23 }
  0xff   :  { %v352_v30 = vpop.f32.mrf.mxu0  ;;  %p451_p6 = scmp.ne.s32.totalorder %s287_s23, %s450_s3  ;;  %p456_p8 = scmp.lt.s32.totalorder %s450_s3, %s450_s3 }
 0x100   :  { %256 = vst.msk [vmem:[#allocation10 + $0x8] sm:$0xff] %vm74_vm1, %v252_v29 }
 0x101   :  { %p457_p9 = por %p456_p8, %p455_p7 }
 0x103   :  { %p458_p10 = pnand %p457_p9, %p451_p6 }
 0x105   :  { %461 = shalt.err (!%p458_p10)
}
 0x106   :  { %292 = dma.vmem_to_hbm [thread:$0]  %s287_s23, 256, %s572_s5, [#allocation9], %s479_s21, %s479_s21, %s480_s22  }
 0x107   :  { %474 = dma.done.wait [#allocation4], 256  }
 0x108   :  { %475 = vsyncadd [#allocation4], 4294967040 }
 0x109   :  { %476 = dma.done.wait [#allocation9], 512  }
 0x10a   :  { %477 = vsyncadd [#allocation9], 4294966784 }
 0x10b   :  { %302 = vsyncpa [#allocation3], 1 }
 0x10c   :  { %303 = vsyncpa [#allocation6], 1 }
 0x10d   :  { %304 = vsyncpa [#allocation4], 1 }
 0x10e   :  { %305 = vsyncpa [#allocation9], 1 }

</bundles_post_ra>
